<compile_context>
chip_gen: v7x
topology: tpu7x:2x2x1
jax: 0.10.0
libtpu: 0.0.40
codegen_flags: <defaults>
</compile_context>

<pallas_src>
import math

import jax
import jax.numpy as jnp
from jax.experimental import pallas as pl
from jax.experimental.pallas import tpu as pltpu

BN_EPS = 1e-5
LANE = 128


def _round_up(n, m):
    return ((n + m - 1) // m) * m


def _pad_axis(a, target, axis):
    pad = target - a.shape[axis]
    if pad <= 0:
        return a
    widths = [(0, 0)] * a.ndim
    widths[axis] = (0, pad)
    return jnp.pad(a, widths)


# ------------------------- in-kernel building blocks ------------------------ #

def _batchnorm(y):
    """BatchNorm1d(affine=False), training mode. Centered two-pass variance."""
    mean = jnp.mean(y, axis=0, keepdims=True)
    centered = y - mean
    var = jnp.mean(centered * centered, axis=0, keepdims=True)
    return centered * jax.lax.rsqrt(var + BN_EPS)


def _make_dcca_kernel(n_layers):
    """Fused kernel. grid axis 0 selects the tower purely via BlockSpec index_maps;
    the body is tower-agnostic (no pl.when branching)."""

    def kernel(*refs):
        x_ref = refs[0]
        param_refs = refs[1:-1]
        o_ref = refs[-1]

        h = x_ref[0]  # (batch, in_pad) f32
        for l in range(n_layers):
            w = param_refs[2 * l][0]        # (in_pad, out_pad) bf16 (MXU operand)
            b = param_refs[2 * l + 1][0]    # (1, out_pad) f32
            if l == n_layers - 1:
                # final layer: BatchNorm -> Linear
                h = _batchnorm(h)
                h = jnp.dot(h.astype(w.dtype), w,
                            preferred_element_type=jnp.float32) + b
            else:
                # hidden layer: Linear -> Sigmoid -> BatchNorm
                h = jnp.dot(h.astype(w.dtype), w,
                            preferred_element_type=jnp.float32) + b
                h = 0.5 * (jnp.tanh(0.5 * h) + 1.0)  # sigmoid on the EUP
                h = _batchnorm(h)
        o_ref[0] = h.astype(o_ref.dtype)

    return kernel


# --------------------------------- wrapper ---------------------------------- #

def init_mlp_params(key, layer_sizes, input_size):
    """nn.Linear-style init, U(-1/sqrt(fan_in), 1/sqrt(fan_in)); W is (in, out)."""
    sizes = [input_size] + list(layer_sizes)
    params = []
    for l_id in range(len(sizes) - 1):
        key, kw, kb = jax.random.split(key, 3)
        fan_in, fan_out = sizes[l_id], sizes[l_id + 1]
        bound = 1.0 / math.sqrt(fan_in)
        w = jax.random.uniform(kw, (fan_in, fan_out), jnp.float32, -bound, bound)
        b = jax.random.uniform(kb, (fan_out,), jnp.float32, -bound, bound)
        params.append((w, b))
    return params


def prepare_stacked_params(params1, params2):
    """One-time prep (hoisted out of the hot path): pad every layer's (W, b) to
    common lane-aligned shapes across towers, stack on a leading tower axis,
    cast MXU operands (weights) to bf16.  Zero padding is exact: padded hidden
    columns normalize to 0 after BN and meet zero next-layer rows."""
    assert len(params1) == len(params2), "towers must have the same depth"
    n_layers = len(params1)
    flat = []
    for l in range(n_layers):
        w1, b1 = params1[l]
        w2, b2 = params2[l]
        in_pad = _round_up(max(w1.shape[0], w2.shape[0]), LANE)
        out_pad = _round_up(max(w1.shape[1], w2.shape[1]), LANE)
        w1p = _pad_axis(_pad_axis(w1.astype(jnp.float32), in_pad, 0), out_pad, 1)
        w2p = _pad_axis(_pad_axis(w2.astype(jnp.float32), in_pad, 0), out_pad, 1)
        b1p = _pad_axis(b1.astype(jnp.float32).reshape(1, -1), out_pad, 1)
        b2p = _pad_axis(b2.astype(jnp.float32).reshape(1, -1), out_pad, 1)
        flat.append(jnp.stack([w1p, w2p], axis=0).astype(jnp.bfloat16))  # (2,in,out)
        flat.append(jnp.stack([b1p, b2p], axis=0))                       # (2,1,out) f32
    in_pad0 = flat[0].shape[1]
    od1 = params1[-1][0].shape[1]
    od2 = params2[-1][0].shape[1]
    return flat, in_pad0, od1, od2


def make_deep_cca_forward(params1, params2):
    flat_params, in_pad0, od1, od2 = prepare_stacked_params(params1, params2)
    n_layers = len(params1)
    out_pad = flat_params[-2].shape[2]

    def _fwd(x1, x2):
        batch = x1.shape[0]

        # Lane-dense inputs: pad feature dim to the common 128-aligned width.
        x = jnp.stack([_pad_axis(x1.astype(jnp.float32), in_pad0, 1),
                       _pad_axis(x2.astype(jnp.float32), in_pad0, 1)], axis=0)

        # Per-tower blocking: each grid step DMAs only its own tower's slab.
        in_specs = [pl.BlockSpec((1, batch, in_pad0), lambda t: (t, 0, 0))]
        for p in flat_params:
            in_specs.append(pl.BlockSpec((1,) + p.shape[1:], lambda t: (t, 0, 0)))
        out_spec = pl.BlockSpec((1, batch, out_pad), lambda t: (t, 0, 0))

        # Explicit scoped-VMEM budget: double-buffered per-tower residency + headroom,
        # clamped to v7x's 64 MiB physical VMEM.
        tower_bytes = batch * in_pad0 * 4 + batch * out_pad * 4
        for p in flat_params:
            tower_bytes += math.prod(p.shape[1:]) * p.dtype.itemsize
        vmem_limit = int(min(max(2 * tower_bytes + (8 << 20), 32 << 20), 64 << 20))

        out = pl.pallas_call(
            _make_dcca_kernel(n_layers),
            out_shape=jax.ShapeDtypeStruct((2, batch, out_pad), jnp.float32),
            grid=(2,),  # tower axis: megacore-split on v7x, cheap pipelined loop else
            in_specs=in_specs,
            out_specs=out_spec,
            compiler_params=pltpu.CompilerParams(
                dimension_semantics=("parallel",),
                vmem_limit_bytes=vmem_limit,
            ),
        )(x, *flat_params)

        return out[0, :, :od1], out[1, :, :od2]

    return jax.jit(_fwd)


# ----------------------------- pure-JAX reference ---------------------------- #

def _bn_ref(y):
    mean = jnp.mean(y, axis=0, keepdims=True)
    centered = y - mean
    var = jnp.mean(centered * centered, axis=0, keepdims=True)
    return centered / jnp.sqrt(var + BN_EPS)


def _mlp_forward_ref(params, x):
    """Mirrors the kernel's numerics choice of bf16 MXU operands / f32 accumulate."""
    n = len(params)
    h = x.astype(jnp.float32)
    for i, (w, b) in enumerate(params):
        wb = w.astype(jnp.bfloat16)
        if i == n - 1:
            h = _bn_ref(h)
            h = jnp.dot(h.astype(jnp.bfloat16), wb,
                        preferred_element_type=jnp.float32) + b
        else:
            h = jnp.dot(h.astype(jnp.bfloat16), wb,
                        preferred_element_type=jnp.float32) + b
            h = 1.0 / (1.0 + jnp.exp(-h))
            h = _bn_ref(h)
    return h


# ----------------------------------- main ------------------------------------ #

if __name__ == "__main__":
    # Small shapes consistent with DeepCCA: x1, x2 are (batch, feats).
    batch = 8
    input_size1, input_size2 = 32, 24
    layer_sizes1 = [32, 16]   # hidden=32, outdim_size=16
    layer_sizes2 = [32, 16]

    root = jax.random.PRNGKey(0)
    k_p1, k_p2, k_x1, k_x2 = jax.random.split(root, 4)

    params1 = init_mlp_params(k_p1, layer_sizes1, input_size1)
    params2 = init_mlp_params(k_p2, layer_sizes2, input_size2)

    x1 = jax.random.normal(k_x1, (batch, input_size1), jnp.float32)
    x2 = jax.random.normal(k_x2, (batch, input_size2), jnp.float32)

    deep_cca_forward = make_deep_cca_forward(params1, params2)
    out1, out2 = deep_cca_forward(x1, x2)
    jax.block_until_ready((out1, out2))

    # correctness vs. pure-JAX reference (same bf16-matmul/f32-acc numerics)
    ref1 = _mlp_forward_ref(params1, x1)
    ref2 = _mlp_forward_ref(params2, x2)

    assert out1.shape == (batch, layer_sizes1[-1])
    assert out2.shape == (batch, layer_sizes2[-1])
    assert jnp.all(jnp.isfinite(out1)) and jnp.all(jnp.isfinite(out2))
    assert jnp.allclose(out1, ref1, atol=3e-3, rtol=3e-3), float(jnp.max(jnp.abs(out1 - ref1)))
    assert jnp.allclose(out2, ref2, atol=3e-3, rtol=3e-3), float(jnp.max(jnp.abs(out2 - ref2)))

    print("KERNEL_OK")
</pallas_src>

<mosaic_0001>
module attributes {stable_mosaic.version = 11 : i64} {
  func.func @kernel(%arg0: i32, %arg1: memref<1x8x128xf32, #tpu.memory_space<vmem>>, %arg2: memref<1x128x128xbf16, #tpu.memory_space<vmem>>, %arg3: memref<1x1x128xf32, #tpu.memory_space<vmem>>, %arg4: memref<1x128x128xbf16, #tpu.memory_space<vmem>>, %arg5: memref<1x1x128xf32, #tpu.memory_space<vmem>>, %arg6: memref<1x8x128xf32, #tpu.memory_space<vmem>>) attributes {dimension_semantics = [#tpu.dimension_semantics<parallel>], iteration_bounds = array<i64: 2>, scalar_prefetch = 0 : i64, scratch_operands = 0 : i64, tpu.core_type = #tpu.core_type<tc>, window_params = [{transform_indices = @transform_0, window_bounds = array<i64: 1, 8, 128>}, {transform_indices = @transform_1, window_bounds = array<i64: 1, 128, 128>}, {transform_indices = @transform_2, window_bounds = array<i64: 1, 1, 128>}, {transform_indices = @transform_3, window_bounds = array<i64: 1, 128, 128>}, {transform_indices = @transform_4, window_bounds = array<i64: 1, 1, 128>}, {transform_indices = @transform_5, window_bounds = array<i64: 1, 8, 128>}]} {
    %c0 = arith.constant 0 : index
    %c0_0 = arith.constant 0 : index
    %c0_1 = arith.constant 0 : index
    %0 = vector.load %arg1[%c0, %c0_0, %c0_1] : memref<1x8x128xf32, #tpu.memory_space<vmem>>, vector<1x8x128xf32>
    %1 = vector.shape_cast %0 : vector<1x8x128xf32> to vector<8x128xf32>
    %c0_2 = arith.constant 0 : index
    %c0_3 = arith.constant 0 : index
    %c0_4 = arith.constant 0 : index
    %2 = vector.load %arg2[%c0_2, %c0_3, %c0_4] : memref<1x128x128xbf16, #tpu.memory_space<vmem>>, vector<1x128x128xbf16>
    %3 = vector.shape_cast %2 : vector<1x128x128xbf16> to vector<128x128xbf16>
    %c0_5 = arith.constant 0 : index
    %c0_6 = arith.constant 0 : index
    %c0_7 = arith.constant 0 : index
    %4 = vector.load %arg3[%c0_5, %c0_6, %c0_7] : memref<1x1x128xf32, #tpu.memory_space<vmem>>, vector<1x1x128xf32>
    %5 = vector.shape_cast %4 : vector<1x1x128xf32> to vector<1x128xf32>
    %6 = arith.truncf %1 : vector<8x128xf32> to vector<8x128xbf16>
    %cst = arith.constant dense<0.000000e+00> : vector<8x128xf32>
    %7 = tpu.matmul %6, %3, %cst {dimension_numbers = #tpu.dot_dimension_numbers<[1], [0], [0], [1], [0, 0, 1, 1], [], []>} : vector<8x128xbf16>, vector<128x128xbf16>, vector<8x128xf32> -> vector<8x128xf32>
    %8 = vector.broadcast %5 : vector<1x128xf32> to vector<8x128xf32>
    %9 = arith.addf %7, %8 : vector<8x128xf32>
    %cst_8 = arith.constant 5.000000e-01 : f32
    %10 = vector.broadcast %cst_8 : f32 to vector<8x128xf32>
    %11 = arith.mulf %10, %9 : vector<8x128xf32>
    %12 = math.tanh %11 : vector<8x128xf32>
    %cst_9 = arith.constant 1.000000e+00 : f32
    %13 = vector.broadcast %cst_9 : f32 to vector<8x128xf32>
    %14 = arith.addf %12, %13 : vector<8x128xf32>
    %cst_10 = arith.constant 5.000000e-01 : f32
    %15 = vector.broadcast %cst_10 : f32 to vector<8x128xf32>
    %16 = arith.mulf %15, %14 : vector<8x128xf32>
    %cst_11 = arith.constant dense<0.000000e+00> : vector<128xf32>
    %17 = vector.multi_reduction <add>, %16, %cst_11 [0] : vector<8x128xf32> to vector<128xf32>
    %18 = vector.shape_cast %17 : vector<128xf32> to vector<1x128xf32>
    %cst_12 = arith.constant 8.000000e+00 : f32
    %19 = vector.broadcast %cst_12 : f32 to vector<1x128xf32>
    %20 = arith.divf %18, %19 : vector<1x128xf32>
    %21 = vector.broadcast %20 : vector<1x128xf32> to vector<8x128xf32>
    %22 = arith.subf %16, %21 : vector<8x128xf32>
    %23 = arith.mulf %22, %22 : vector<8x128xf32>
    %cst_13 = arith.constant dense<0.000000e+00> : vector<128xf32>
    %24 = vector.multi_reduction <add>, %23, %cst_13 [0] : vector<8x128xf32> to vector<128xf32>
    %25 = vector.shape_cast %24 : vector<128xf32> to vector<1x128xf32>
    %cst_14 = arith.constant 8.000000e+00 : f32
    %26 = vector.broadcast %cst_14 : f32 to vector<1x128xf32>
    %27 = arith.divf %25, %26 : vector<1x128xf32>
    %cst_15 = arith.constant 9.99999974E-6 : f32
    %28 = vector.broadcast %cst_15 : f32 to vector<1x128xf32>
    %29 = arith.addf %27, %28 : vector<1x128xf32>
    %30 = math.rsqrt %29 : vector<1x128xf32>
    %31 = vector.broadcast %30 : vector<1x128xf32> to vector<8x128xf32>
    %32 = arith.mulf %22, %31 : vector<8x128xf32>
    %c0_16 = arith.constant 0 : index
    %c0_17 = arith.constant 0 : index
    %c0_18 = arith.constant 0 : index
    %33 = vector.load %arg4[%c0_16, %c0_17, %c0_18] : memref<1x128x128xbf16, #tpu.memory_space<vmem>>, vector<1x128x128xbf16>
    %34 = vector.shape_cast %33 : vector<1x128x128xbf16> to vector<128x128xbf16>
    %c0_19 = arith.constant 0 : index
    %c0_20 = arith.constant 0 : index
    %c0_21 = arith.constant 0 : index
    %35 = vector.load %arg5[%c0_19, %c0_20, %c0_21] : memref<1x1x128xf32, #tpu.memory_space<vmem>>, vector<1x1x128xf32>
    %36 = vector.shape_cast %35 : vector<1x1x128xf32> to vector<1x128xf32>
    %cst_22 = arith.constant dense<0.000000e+00> : vector<128xf32>
    %37 = vector.multi_reduction <add>, %32, %cst_22 [0] : vector<8x128xf32> to vector<128xf32>
    %38 = vector.shape_cast %37 : vector<128xf32> to vector<1x128xf32>
    %cst_23 = arith.constant 8.000000e+00 : f32
    %39 = vector.broadcast %cst_23 : f32 to vector<1x128xf32>
    %40 = arith.divf %38, %39 : vector<1x128xf32>
    %41 = vector.broadcast %40 : vector<1x128xf32> to vector<8x128xf32>
    %42 = arith.subf %32, %41 : vector<8x128xf32>
    %43 = arith.mulf %42, %42 : vector<8x128xf32>
    %cst_24 = arith.constant dense<0.000000e+00> : vector<128xf32>
    %44 = vector.multi_reduction <add>, %43, %cst_24 [0] : vector<8x128xf32> to vector<128xf32>
    %45 = vector.shape_cast %44 : vector<128xf32> to vector<1x128xf32>
    %cst_25 = arith.constant 8.000000e+00 : f32
    %46 = vector.broadcast %cst_25 : f32 to vector<1x128xf32>
    %47 = arith.divf %45, %46 : vector<1x128xf32>
    %cst_26 = arith.constant 9.99999974E-6 : f32
    %48 = vector.broadcast %cst_26 : f32 to vector<1x128xf32>
    %49 = arith.addf %47, %48 : vector<1x128xf32>
    %50 = math.rsqrt %49 : vector<1x128xf32>
    %51 = vector.broadcast %50 : vector<1x128xf32> to vector<8x128xf32>
    %52 = arith.mulf %42, %51 : vector<8x128xf32>
    %53 = arith.truncf %52 : vector<8x128xf32> to vector<8x128xbf16>
    %cst_27 = arith.constant dense<0.000000e+00> : vector<8x128xf32>
    %54 = tpu.matmul %53, %34, %cst_27 {dimension_numbers = #tpu.dot_dimension_numbers<[1], [0], [0], [1], [0, 0, 1, 1], [], []>} : vector<8x128xbf16>, vector<128x128xbf16>, vector<8x128xf32> -> vector<8x128xf32>
    %55 = vector.broadcast %36 : vector<1x128xf32> to vector<8x128xf32>
    %56 = arith.addf %54, %55 : vector<8x128xf32>
    %c0_28 = arith.constant 0 : index
    %c0_29 = arith.constant 0 : index
    %c0_30 = arith.constant 0 : index
    %57 = vector.load %arg6[%c0_28, %c0_29, %c0_30] : memref<1x8x128xf32, #tpu.memory_space<vmem>>, vector<1x8x128xf32>
    %58 = vector.shape_cast %57 : vector<1x8x128xf32> to vector<8x128xf32>
    %59 = vector.shape_cast %56 : vector<8x128xf32> to vector<1x8x128xf32>
    tpu.vector_store %arg6[%c0_28, %c0_29, %c0_30], %59 {strides = array<i32>} : memref<1x8x128xf32, #tpu.memory_space<vmem>>, vector<1x8x128xf32>,
    return
  }
  func.func @transform_0(%arg0: i32) -> (i32, i32, i32) {
    %c0_i32 = arith.constant 0 : i32
    %c0_i32_0 = arith.constant 0 : i32
    %c0_i32_1 = arith.constant 0 : i32
    return %arg0, %c0_i32, %c0_i32_0 : i32, i32, i32
  }
  func.func @transform_1(%arg0: i32) -> (i32, i32, i32) {
    %c0_i32 = arith.constant 0 : i32
    %c0_i32_0 = arith.constant 0 : i32
    %c0_i32_1 = arith.constant 0 : i32
    return %arg0, %c0_i32, %c0_i32_0 : i32, i32, i32
  }
  func.func @transform_2(%arg0: i32) -> (i32, i32, i32) {
    %c0_i32 = arith.constant 0 : i32
    %c0_i32_0 = arith.constant 0 : i32
    %c0_i32_1 = arith.constant 0 : i32
    return %arg0, %c0_i32, %c0_i32_0 : i32, i32, i32
  }
  func.func @transform_3(%arg0: i32) -> (i32, i32, i32) {
    %c0_i32 = arith.constant 0 : i32
    %c0_i32_0 = arith.constant 0 : i32
    %c0_i32_1 = arith.constant 0 : i32
    return %arg0, %c0_i32, %c0_i32_0 : i32, i32, i32
  }
  func.func @transform_4(%arg0: i32) -> (i32, i32, i32) {
    %c0_i32 = arith.constant 0 : i32
    %c0_i32_0 = arith.constant 0 : i32
    %c0_i32_1 = arith.constant 0 : i32
    return %arg0, %c0_i32, %c0_i32_0 : i32, i32, i32
  }
  func.func @transform_5(%arg0: i32) -> (i32, i32, i32) {
    %c0_i32 = arith.constant 0 : i32
    %c0_i32_0 = arith.constant 0 : i32
    %c0_i32_1 = arith.constant 0 : i32
    return %arg0, %c0_i32, %c0_i32_0 : i32, i32, i32
  }
}

</mosaic_0001>

<bundles_post_ra>
// kernel: _fwd.1
= control target key start
LH: loop header
LB: loop body
LE: loop exit
PB: predicated region body
PF: predicated region fallthrough
CT: control target
= control target key end

     0   :  { %10 = vsyncpa [#allocation3], 0  ;;  %s1222_s0 = inlined_call_operand.vmem [shape: f32[2,8,128], index: 0, kind: input, shape index: {}]   ;;  %s1223_s1 = inlined_call_operand.hbm [shape: bf16[2,128,128], index: 1, kind: input, shape index: {}]   ;;  %s1224_s2 = inlined_call_operand.vmem [shape: f32[2,1,128], index: 2, kind: input, shape index: {}]   ;;  %s1225_s3 = inlined_call_operand.hbm [shape: bf16[2,128,128], index: 3, kind: input, shape index: {}]   ;;  %s1226_s4 = inlined_call_operand.vmem [shape: f32[2,1,128], index: 4, kind: input, shape index: {}]   ;;  %s1227_s5 = inlined_call_operand.vmem [shape: f32[2,8,128], index: 5, kind: output, shape index: {}]  }
   0x1   :  { %12 = vsyncpa [#allocation3 + $0x1], 0 }
   0x2   :  { %13 = vsyncpa [#allocation5], 0 }
   0x3   :  { %15 = vsyncpa [#allocation5 + $0x1], 0  ;;  %s1016_s18 = smov 0   ;;  %s1018_s19 = smov 0  }
   0x4   :  { %s1020_s20 = smov 0   ;;  %s1022_s21 = smov 0  }
   0x5 LB: > { %s1035_s22 = sadd.s32 4294967295, %s978_s21   ;;  %s1038_s23 = sadd.s32 1, %s978_s21   ;;  %s978_s21 = sphi %s1022_s21, %s1237_s21   ;;  %s974_s20 = sphi %s1020_s20, %s1236_s20   ;;  %s970_s19 = sphi %s1018_s19, %s1235_s19   ;;  %s966_s18 = sphi %s1016_s18, %s1234_s18  }
   0x6   : > { %s51_s24 = ssub.s32 %s978_s21, %s1038_s23  ;;  %s54_s25 = sadd.s32 1, %s974_s20 }
   0x7   : > { %p52_p0 = scmp.eq.s32.totalorder %s51_s24, 0  ;;  %p61_p1 = scmp.ne.s32.totalorder %s974_s20, %s970_s19 }
   0x8   : > { %p62_p2 = scmp.eq.s32.totalorder %s978_s21, 0  ;;  %p67_p3 = scmp.ne.s32.totalorder %s970_s19, %s966_s18 }
   0x9   : > { %s1048_s26 = scalar_select %p52_p0, %s974_s20, %s54_s25  }
   0xa   : > { %p63_p4 = por %p62_p2, %p61_p1  ;;  %p68_p5 = scmp.eq.s32.totalorder %s1035_s22, 0 }
   0xb   : > { %p821_p6 = scmp.lt.s32.totalorder %s978_s21, 2  ;;  %s1057_s28 = sand.u32 1, %s974_s20  }
   0xc   : > { %p1052_p7 = por %p68_p5, %p67_p3  ;;  %s719_s29 = sshll.u32 %s1057_s28, 6 }
   0xd   : > { %s750_s30 = sshll.u32 %s978_s21, 10  ;;  %s206_s9 = scalar_lea.vmem [#allocation2], %s719_s29 }
   0xe   : > { %s1229_s27 = scalar_select %p1052_p7, 1, 0 }
   0xf   : > { %s1066_s8 = scalar_lea.hbm %s1223_s1, %s750_s30  ;;  %s213_s10 = sshll.u32 %s206_s9, 4  ;;  %s1070_s10 = int_to_ptr.vmem [resolvable:$true] %s213_s10 }
  0x10   : > { %p1072_p8 = pnand %p821_p6, %p63_p4  ;;  %s203_s12 = scalar_lea.sflag [#allocation3], %s1057_s28 }
  0x11   : > { %s880_s13 = scalar_lea.hbm %s1066_s8, 1024  ;;  %s885_s16 = scalar_lea.hbm %s1223_s1, 2048 }
  0x12   : > { %p881_p10 = scmp.ne.s32.totalorder %s1066_s8, %s880_s13  ;;  %p882_p11 = pneg %p1072_p8 }
  0x13   : > { %p886_p0 = scmp.lt.u32.totalorder %s1066_s8, %s1223_s1  ;;  %p887_p1 = scmp.lt.u32.totalorder %s885_s16, %s880_s13 }
  0x14   : > { %p883_p12 = pnand %p882_p11, %p881_p10  ;;  %p889_p3 = scmp.lt.u32.totalorder %s880_s13, %s1066_s8 }
  0x15   : > { %p888_p2 = por %p887_p1, %p886_p0 }
  0x16   : > { %p884_p13 = pneg %p883_p12 }
  0x17   : > { %p890_p4 = por %p889_p3, %p888_p2 }
  0x19   : > { %p891_p5 = pnand %p890_p4, %p884_p13 }
  0x1b   : > { %894 = shalt.err (!%p891_p5)
}
  0x1c   : > { %s895_s24 = scalar_lea.vmem %s1070_s10, 1024  ;;  %s980_s25 = smov [#allocation2]  }
  0x1d   : > { %p896_p6 = scmp.ne.s32.totalorder %s1070_s10, %s895_s24  ;;  %s900_s6 = sshll.u32 %s980_s25, 4  ;;  %s901_s6 = int_to_ptr.vmem [resolvable:$false] %s900_s6 }
  0x1e   : > { %s902_s7 = scalar_lea.vmem %s901_s6, 2048  ;;  %p903_p9 = scmp.lt.s32.totalorder %s1070_s10, %s901_s6 }
  0x1f   : > { %p898_p10 = pnand %p896_p6, %p882_p11  ;;  %p904_p0 = scmp.lt.s32.totalorder %s902_s7, %s895_s24 }
  0x21   : > { %p899_p12 = pneg %p898_p10  ;;  %p905_p1 = por %p904_p0, %p903_p9 }
  0x23   : > { %p906_p2 = pnand %p905_p1, %p899_p12 }
  0x25   : > { %909 = shalt.err (!%p906_p2)
}
  0x26   : > { %s981_s9 = smov 64   ;;  %s982_s13 = smov 4  }
  0x27   : > { %817 = dma.hbm_to_vmem [thread:$0]  (!%p1072_p8), %s1066_s8, 1024, %s1070_s10, %s203_s12, %s981_s9, %s981_s9, %s982_s13  }
  0x28   : > { %p254_p9 = scmp.lt.s32.totalorder %s978_s21, 3  ;;  %s1114_s16 = scalar_lea.hbm %s1225_s3, %s750_s30 }
  0x29   : > { %p1231_p13 = scmp.ge.s32.totalorder %s978_s21, 1  ;;  %s233_s18 = scalar_lea.vmem [#allocation4], %s719_s29 }
  0x2a   : > { %s240_s24 = sshll.u32 %s233_s18, 4  ;;  %s230_s8 = scalar_lea.sflag [#allocation5], %s1057_s28  ;;  %s1124_s24 = int_to_ptr.vmem [resolvable:$true] %s240_s24 }
  0x2b   : > { %p1118_p3 = pnand %p1231_p13, %p254_p9  ;;  %s910_s10 = scalar_lea.hbm %s1114_s16, 1024 }
  0x2c   : > { %p911_p4 = scmp.ne.s32.totalorder %s1114_s16, %s910_s10  ;;  %s915_s12 = scalar_lea.hbm %s1225_s3, 2048 }
  0x2d   : > { %p916_p10 = scmp.lt.u32.totalorder %s1114_s16, %s1225_s3  ;;  %p917_p12 = scmp.lt.u32.totalorder %s915_s12, %s910_s10 }
  0x2e   : > { %p913_p5 = pnand %p911_p4, %p882_p11  ;;  %p919_p1 = scmp.lt.u32.totalorder %s910_s10, %s1114_s16 }
  0x2f   : > { %p918_p0 = por %p917_p12, %p916_p10 }
  0x30   : > { %p914_p6 = pneg %p913_p5 }
  0x31   : > { %p920_p2 = por %p919_p1, %p918_p0 }
  0x33   : > { %p921_p9 = pnand %p920_p2, %p914_p6 }
  0x35   : > { %924 = shalt.err (!%p921_p9)
}
  0x36   : > { %s925_s29 = scalar_lea.vmem %s1124_s24, 1024  ;;  %s983_s7 = smov [#allocation4]  }
  0x37   : > { %p926_p13 = scmp.ne.s32.totalorder %s1124_s24, %s925_s29  ;;  %s930_s14 = sshll.u32 %s983_s7, 4  ;;  %s931_s14 = int_to_ptr.vmem [resolvable:$false] %s930_s14 }
  0x38   : > { %s932_s15 = scalar_lea.vmem %s931_s14, 2048  ;;  %p933_p7 = scmp.lt.s32.totalorder %s1124_s24, %s931_s14 }
  0x39   : > { %p928_p4 = pnand %p926_p13, %p882_p11  ;;  %p934_p10 = scmp.lt.s32.totalorder %s932_s15, %s925_s29 }
  0x3b   : > { %p929_p5 = pneg %p928_p4  ;;  %p935_p12 = por %p934_p10, %p933_p7 }
  0x3d   : > { %p936_p0 = pnand %p935_p12, %p929_p5 }
  0x3f   : > { %939 = shalt.err (!%p936_p0)
}
  0x40   : > { %820 = dma.hbm_to_vmem [thread:$0]  (!%p1072_p8), %s1114_s16, 1024, %s1124_s24, %s230_s8, %s981_s9, %s981_s9, %s982_s13  }
  0x41   : > { %258 = sbr.rel (%p1118_p3) target bundleno = 651 (0x28b), region = 40  ;;  %s260_s18 = sand.u32 (!%p1118_p3), 1, %s970_s19  }
  0x42   : > { %s726_s10 = sshll.u32 (!%p1118_p3), %s260_s18, 6  ;;  %s261_s21 = scalar_lea.sflag (!%p1118_p3), [#allocation3], %s260_s18 }
  0x43   : > { %s1158_s30 = scalar_lea.vmem (!%p1118_p3), [#allocation2], %s726_s10  ;;  %p1233_p7 = scmp.ne.s32.totalorder (!%p1118_p3), %s1229_s27, 0 }
  0x48   : > { %957 = dma.done.wait (%p1233_p7), %s261_s21, 1024  }
  0x49   : > { %959 = vsyncadd (%p1233_p7), %s261_s21, 4294966272  ;;  %s270_s28 = scalar_lea.sflag [#allocation5], %s260_s18  ;;  %s1164_s11 = scalar_lea.vmem [#allocation4], %s726_s10 }
  0x4a   : > { %961 = dma.done.wait (%p1233_p7), %s270_s28, 1024  }
  0x4b   : > { %963 = vsyncadd (%p1233_p7), %s270_s28, 4294966272  ;;  %v984_v0 = vmov 0.0   ;;  %vm985_vm0 = vmmov 0   ;;  %v858_v1 = vld [vmem:[%s1158_s30] sm:$0xff]   ;;  %v859_v2 = vld [vmem:[%s1158_s30 + $0x8] sm:$0xff]   ;;  %p314_p8 = scmp.lt.s32.totalorder %s1035_s22, 1 }
  0x4c   : > { %770 = vmatprep.subr.bf16.mxu0 %v984_v0  ;;  %786 = vmatprep.mubr.msk.bf16.mxu0 %vm985_vm0, %v984_v0  ;;  %v860_v3 = vld [vmem:[%s1158_s30 + $0x10] sm:$0xff]   ;;  %v861_v4 = vld [vmem:[%s1158_s30 + $0x18] sm:$0xff]   ;;  %v862_v5 = vld [vmem:[%s1158_s30 + $0x20] sm:$0xff]  }
  0x4d   : > { %790 = vmatprep.subr.bf16.mxu1 %v984_v0  ;;  %806 = vmatprep.mubr.msk.bf16.mxu1 %vm985_vm0, %v984_v0  ;;  %s1239_s22 = smov (!%p314_p8, %s1035_s22), 1  ;;  %v863_v6 = vld [vmem:[%s1158_s30 + $0x28] sm:$0xff]   ;;  %v864_v7 = vld [vmem:[%s1158_s30 + $0x30] sm:$0xff]   ;;  %v865_v8 = vld [vmem:[%s1158_s30 + $0x38] sm:$0xff]  }
  0x4e   : > { %771 = vmatpush3.bf16.msra.mxu0 %v858_v1  ;;  %s728_s27 = sshll.u32 %s1239_s22, 3  ;;  %v866_v11 = vld [vmem:[%s1164_s11] sm:$0xff]   ;;  %v867_v12 = vld [vmem:[%s1164_s11 + $0x8] sm:$0xff]   ;;  %v868_v13 = vld [vmem:[%s1164_s11 + $0x10] sm:$0xff]   ;;  %s320_s8 = scalar_lea.vmem %s1224_s2, %s1239_s22 }
  0x4f   : > { %772 = vmatprep.subr.bf16.mxu0 %v984_v0  ;;  %s317_s16 = scalar_lea.vmem %s1222_s0, %s728_s27  ;;  %791 = vmatpush3.bf16.msra.mxu1 %v866_v11  ;;  %v869_v14 = vld [vmem:[%s1164_s11 + $0x18] sm:$0xff]   ;;  %v870_v15 = vld [vmem:[%s1164_s11 + $0x20] sm:$0xff]   ;;  %v871_v16 = vld [vmem:[%s1164_s11 + $0x28] sm:$0xff]   ;;  %s323_s6 = scalar_lea.vmem %s1226_s4, %s1239_s22 }
  0x50   : > { %v329_v9 = vld [vmem:[%s317_s16] sm:$0xff]  ;;  %792 = vmatprep.subr.bf16.mxu1 %v984_v0  ;;  %v872_v17 = vld [vmem:[%s1164_s11 + $0x30] sm:$0xff]   ;;  %v873_v18 = vld [vmem:[%s1164_s11 + $0x38] sm:$0xff]   ;;  %s327_s14 = scalar_lea.vmem %s1227_s5, %s728_s27 }
  0x51   : > { %v347_v10 = vpack.c.bf16 %v329_v9, %v329_v9  ;;  %v730_v19 = vld [vmem:[%s320_s8] ss:$0 sm:$0xff] }
  0x52   : > { %773 = vmatpush3.bf16.msra.mxu0 %v859_v2 }
  0x53   : > { %774 = vmatprep.subr.bf16.mxu0 %v984_v0  ;;  %793 = vmatpush3.bf16.msra.mxu1 %v867_v12 }
  0x54   : > { %794 = vmatprep.subr.bf16.mxu1 %v984_v0 }
  0x56   : > { %775 = vmatpush3.bf16.msra.mxu0 %v860_v3 }
  0x57   : > { %776 = vmatprep.subr.bf16.mxu0 %v984_v0  ;;  %795 = vmatpush3.bf16.msra.mxu1 %v868_v13 }
  0x58   : > { %796 = vmatprep.subr.bf16.mxu1 %v984_v0 }
  0x5a   : > { %777 = vmatpush3.bf16.msra.mxu0 %v861_v4  ;;  %v739_v4 = vld [vmem:[%s323_s6] ss:$0 sm:$0xff] }
  0x5b   : > { %778 = vmatprep.subr.bf16.mxu0 %v984_v0  ;;  %797 = vmatpush3.bf16.msra.mxu1 %v869_v14 }
  0x5c   : > { %798 = vmatprep.subr.bf16.mxu1 %v984_v0 }
  0x5e   : > { %779 = vmatpush3.bf16.msra.mxu0 %v862_v5 }
  0x5f   : > { %780 = vmatprep.subr.bf16.mxu0 %v984_v0  ;;  %799 = vmatpush3.bf16.msra.mxu1 %v870_v15 }
  0x60   : > { %800 = vmatprep.subr.bf16.mxu1 %v984_v0 }
  0x62   : > { %781 = vmatpush3.bf16.msra.mxu0 %v863_v6 }
  0x63   : > { %782 = vmatprep.subr.bf16.mxu0 %v984_v0  ;;  %801 = vmatpush3.bf16.msra.mxu1 %v871_v16 }
  0x64   : > { %802 = vmatprep.subr.bf16.mxu1 %v984_v0 }
  0x66   : > { %783 = vmatpush3.bf16.msra.mxu0 %v864_v7 }
  0x67   : > { %784 = vmatprep.subr.bf16.mxu0 %v984_v0  ;;  %803 = vmatpush3.bf16.msra.mxu1 %v872_v17 }
  0x68   : > { %804 = vmatprep.subr.bf16.mxu1 %v984_v0 }
  0x6a   : > { %785 = vmatpush3.bf16.msra.mxu0 %v865_v8 }
  0x6b   : > { %805 = vmatpush3.bf16.msra.mxu1 %v873_v18 }
  0x6d   : > { %787 = vmatmul.mubr.bf16.vlgmr.msra.gmra.mrb[0].mxu0 %v347_v10 }
 0x140   : > { %v436_v20 = vpop.f32.mrb[0].mxu0 }
 0x141   : > { %v437_v21 = vadd.f32 %v730_v19, %v436_v20  ;;  %v788_v22 = vpop.f32.mrb[1].mxu0 }
 0x142   : > { %v439_v23 = vpop.f32.mrb[2].mxu0 }
 0x143   : > { %v442_v24 = vmul.f32 0.5, %v437_v21  ;;  %v789_v25 = vpop.f32.mrb[3].mxu0 }
 0x145   : > { %874 = vtanh.f32 %v442_v24 }
 0x14f   : > { %v875_v26 = vpop.eup %874 }
 0x150   : > { %v444_v27 = vadd.f32 1.0, %v875_v26 }
 0x152   : > { %v445_v28 = vmul.f32 0.5, %v444_v27 }
 0x154   : > { %v446_v29 = vrot.slane %v445_v28, 4 }
 0x156   : > { %v447_v30 = vadd.f32 %v446_v29, %v445_v28 }
 0x158   : > { %v448_v31 = vrot.slane %v447_v30, 2 }
 0x15a   : > { %v449_v32 = vadd.f32 %v448_v31, %v447_v30 }
 0x15c   : > { %v450_v33 = vrot.slane %v449_v32, 1 }
 0x15e   : > { %v451_v34 = vadd.f32 %v450_v33, %v449_v32 }
 0x160   : > { %v453_v35 = vmul.f32 0.125, %v451_v34 }
 0x162   : > { %v454_v36 = vsub.f32 %v445_v28, %v453_v35 }
 0x164   : > { %v455_v37 = vmul.f32 %v454_v36, %v454_v36 }
 0x166   : > { %v456_v38 = vrot.slane %v455_v37, 4 }
 0x168   : > { %v457_v39 = vadd.f32 %v456_v38, %v455_v37 }
 0x16a   : > { %v458_v40 = vrot.slane %v457_v39, 2 }
 0x16c   : > { %v459_v41 = vadd.f32 %v458_v40, %v457_v39 }
 0x16e   : > { %v460_v42 = vrot.slane %v459_v41, 1 }
 0x170   : > { %v461_v43 = vadd.f32 %v460_v42, %v459_v41 }
 0x172   : > { %v462_v44 = vmul.f32 0.125, %v461_v43 }
 0x174   : > { %v463_v45 = vadd.f32 1e-05, %v462_v44 }
 0x176   : > { %876 = vrsqrt.f32 %v463_v45 }
 0x180   : > { %v877_v46 = vpop.eup %876 }
 0x181   : > { %v465_v47 = vmul.f32 %v877_v46, %v454_v36 }
 0x183   : > { %v483_v48 = vrot.slane %v465_v47, 4 }
 0x185   : > { %v484_v49 = vadd.f32 %v483_v48, %v465_v47 }
 0x187   : > { %v485_v50 = vrot.slane %v484_v49, 2 }
 0x189   : > { %v486_v51 = vadd.f32 %v485_v50, %v484_v49 }
 0x18b   : > { %v487_v52 = vrot.slane %v486_v51, 1 }
 0x18d   : > { %v488_v53 = vadd.f32 %v487_v52, %v486_v51 }
 0x18f   : > { %v489_v54 = vmul.f32 0.125, %v488_v53 }
 0x191   : > { %v490_v55 = vsub.f32 %v465_v47, %v489_v54 }
 0x193   : > { %v491_v56 = vmul.f32 %v490_v55, %v490_v55 }
 0x195   : > { %v492_v57 = vrot.slane %v491_v56, 4 }
 0x197   : > { %v493_v58 = vadd.f32 %v492_v57, %v491_v56 }
 0x199   : > { %v494_v59 = vrot.slane %v493_v58, 2 }
 0x19b   : > { %v495_v60 = vadd.f32 %v494_v59, %v493_v58 }
 0x19d   : > { %v496_v61 = vrot.slane %v495_v60, 1 }
 0x19f   : > { %v497_v62 = vadd.f32 %v496_v61, %v495_v60 }
 0x1a1   : > { %v498_v63 = vmul.f32 0.125, %v497_v62 }
 0x1a3   : > { %v499_v0 = vadd.f32 1e-05, %v498_v63 }
 0x1a5   : > { %878 = vrsqrt.f32 %v499_v0 }
 0x1af   : > { %v879_v1 = vpop.eup %878 }
 0x1b0   : > { %v501_v2 = vmul.f32 %v879_v1, %v490_v55 }
 0x1b2   : > { %v502_v3 = vpack.c.bf16 %v501_v2, %v501_v2 }
 0x1b4   : > { %807 = vmatmul.mubr.bf16.vlgmr.msra.gmra.mrb[0].mxu1 %v502_v3 }
 0x287   : > { %v591_v5 = vpop.f32.mrb[0].mxu1 }
 0x288   : > { %v592_v6 = vadd.f32 %v739_v4, %v591_v5  ;;  %v808_v7 = vpop.f32.mrb[1].mxu1 }
 0x289   : > { %v594_v8 = vpop.f32.mrb[2].mxu1 }
 0x28a   : > { %597 = vst [vmem:[%s327_s14] sm:$0xff] %v592_v6  ;;  %v809_v9 = vpop.f32.mrb[3].mxu1 }
 0x28b PF: > { %p18_p11 = scmp.ge.s32.totalorder %s1038_s23, 4   ;;  %s1234_s18 = smov %s970_s19 }
 0x28c   : > { %s1235_s19 = smov %s974_s20  ;;  %s1236_s20 = smov %s1048_s26 }
 0x28d   : > { %s1237_s21 = smov %s1038_s23  ;;  %20 = sbr.rel (!%p18_p11) target bundleno = 5 (0x5), region = 102 }
 0x294   :  { %617 = vsyncpa [#allocation3], 1 }
 0x295   :  { %619 = vsyncpa [#allocation3 + $0x1], 1 }
 0x296   :  { %620 = vsyncpa [#allocation5], 1 }
 0x297   :  { %622 = vsyncpa [#allocation5 + $0x1], 1 }

</bundles_post_ra>
